<compile_context>
chip_gen: v7x
topology: tpu7x:2x2x1
jax: 0.10.0
libtpu: 0.0.40
codegen_flags: <defaults>
</compile_context>

<pallas_src>
import jax
import jax.numpy as jnp
from jax.experimental import pallas as pl
from jax.experimental.pallas import tpu as pltpu


def _round_up(x, m):
    return ((x + m - 1) // m) * m


def _cdiv(a, b):
    return (a + b - 1) // b


def _linear_lm_kernel(ids_ref, hlm_ref, tab_ref, w1_ref, b1_ref, w2_ref, b2_ref,
                      out_ref, h_ref):
    # ids_ref : (TM, 1)        int32  token ids (streamed)
    # hlm_ref : (TM, lm_hid)   f32    LM hidden states (streamed)
    # tab_ref : (nin_p, nhid_p) f32   embedding table (VMEM-resident, exact gather)
    # w1/b1   : LMEmbed.proj   (lm_hid, nhid_p) bf16, (1, nhid_p) f32 (resident)
    # w2/b2   : Linear.proj    (nhid_p, TN) bf16, (1, TN) f32 (streamed over j)
    # out_ref : (TM, TN)       out_dtype
    # h_ref   : (TM, nhid_p)   bf16   hidden activation scratch (reused over j)
    j = pl.program_id(1)

    @pl.when(j == 0)
    def _():
        tm = ids_ref.shape[0]
        nin_p = tab_ref.shape[0]
        # Embedding gather as a one-hot MXU matmul against the resident f32 table
        # (exact: one-hot entries are 0/1, accumulation in f32).
        onehot = (jax.lax.broadcasted_iota(jnp.int32, (tm, nin_p), 1)
                  == ids_ref[...]).astype(tab_ref.dtype)
        emb = jnp.dot(onehot, tab_ref[...], preferred_element_type=jnp.float32)
        # LMEmbed.proj: bf16 MXU operands, f32 accumulation (explicit accuracy choice).
        proj = jnp.dot(hlm_ref[...].astype(jnp.bfloat16), w1_ref[...],
                       preferred_element_type=jnp.float32) + b1_ref[...]
        # Elementwise add + ReLU in f32 (v5e VPU has no bf16); store bf16 for the
        # second MXU matmul.
        h_ref[...] = jnp.maximum(emb + proj, 0.0).astype(h_ref.dtype)

    # Linear.proj for this nout tile (h reused across all j for the row tile).
    z = jnp.dot(h_ref[...], w2_ref[...], preferred_element_type=jnp.float32) + b2_ref[...]
    out_ref[...] = z.astype(out_ref.dtype)


def linear_lm_forward(x, h_lm, embed_table, w1, b1, w2, b2, *,
                      tm=512, tn=1024, out_dtype=jnp.float32):
    """Forward pass of `Linear` (lm=True path).

    x:           (B, S) int32 token ids
    h_lm:        (B, S, lm_hidden) float32  -- stands in for lm.encode(x)
    embed_table: (nin, nhidden) float32     (padding row already zeroed)
    returns:     (B, S, nout) out_dtype
    """
    B, S = x.shape
    N = B * S
    lm_hidden = h_lm.shape[-1]
    nin, nhidden = embed_table.shape
    nout = w2.shape[1]

    # Lane-aligned matmul N dims (128 everywhere; bump to 256 on v6e/v7x if the
    # edge passes show up in profiles).  Vocab padded to sublane multiple only.
    nin_p = _round_up(nin, 8)
    nhid_p = _round_up(nhidden, 128)
    nout_p = _round_up(nout, 128)

    # ---- row tile -----------------------------------------------------------
    TM = min(tm, _round_up(N, 16))          # multiple of 16 -> clean bf16 sublane packing
    if N >= 32 and _cdiv(N, TM) < 2:
        # >=2 row tiles so "parallel" semantics can shard across v7x's two TCs.
        TM = _round_up(_cdiv(N, 2), 16)
    grid_i = _cdiv(N, TM)                   # partial last tile handled by Pallas

    # ---- nout tile ----------------------------------------------------------
    # Single tile unless w2 alone would blow the VMEM budget (v7x: 64 MiB);
    # then stream column tiles of w2 and reuse the per-row-tile h scratch.
    w2_vmem = 2 * nhid_p * nout_p           # bf16, double-buffered
    TN = nout_p if w2_vmem <= (16 << 20) else min(nout_p, _round_up(tn, 128))
    grid_j = _cdiv(nout_p, TN)

    # ---- wrapper-side prep (no full-size activation copies) ----------------
    ids = x.reshape(N, 1).astype(jnp.int32)     # streamed, 4 B / row
    hlm = h_lm.reshape(N, lm_hidden)            # streamed in native f32 (cast in-kernel)

    def pad2(a, rows, cols, dtype):
        a = a.astype(dtype)
        pr, pc = rows - a.shape[0], cols - a.shape[1]
        if pr or pc:                            # skip the copy when already aligned
            a = jnp.pad(a, ((0, pr), (0, pc)))
        return a

    tab_p = pad2(embed_table, nin_p, nhid_p, jnp.float32)
    w1_p = pad2(w1, lm_hidden, nhid_p, jnp.bfloat16)
    b1_p = pad2(b1, 1, nhid_p, jnp.float32)
    w2_p = pad2(w2, nhid_p, nout_p, jnp.bfloat16)
    b2_p = pad2(b2, 1, nout_p, jnp.float32)

    # ---- VMEM budget from the actual footprint ------------------------------
    out_isize = jnp.dtype(out_dtype).itemsize
    vmem_needed = (
        2 * (TM * 4 + TM * lm_hidden * 4)                         # streamed ids + hlm (x2 bufs)
        + 2 * (nhid_p * TN * 2 + TN * 4)                          # streamed w2/b2 tiles
        + 2 * (TM * TN * out_isize)                               # streamed output tile
        + 2 * (nin_p * nhid_p * 4 + lm_hidden * nhid_p * 2 + nhid_p * 4)  # resident table/w1/b1
        + TM * nhid_p * 2                                         # h scratch
    )
    try:
        vmem_cap = int(pltpu.get_tpu_info().vmem_capacity_bytes)
    except Exception:
        vmem_cap = 64 * 1024 * 1024          # assume the smallest generation (v7x)
    vmem_limit = int(vmem_needed * 1.25) + (2 << 20)
    vmem_limit = max(vmem_limit, 16 << 20)
    vmem_limit = min(vmem_limit, int(vmem_cap * 0.9))
    vmem_limit = max(vmem_limit, int(vmem_needed) + (1 << 20))

    flops = 2 * N * nhid_p * (nin_p + lm_hidden) + 2 * N * nhid_p * nout_p
    bytes_accessed = (
        N * 4 + N * lm_hidden * 4 + N * nout_p * out_isize
        + nin_p * nhid_p * 4 + lm_hidden * nhid_p * 2 + nhid_p * 4
        + (grid_i if grid_j > 1 else 1) * (nhid_p * nout_p * 2 + nout_p * 4)
    )

    def build_specs(single_buffer_weights):
        if single_buffer_weights:
            def const_spec(shape):
                return pl.BlockSpec(shape, lambda i, j: (0, 0),
                                    pipeline_mode=pl.Buffered(1))
        else:
            def const_spec(shape):
                return pl.BlockSpec(shape, lambda i, j: (0, 0))
        in_specs = [
            pl.BlockSpec((TM, 1), lambda i, j: (i, 0)),           # token ids
            pl.BlockSpec((TM, lm_hidden), lambda i, j: (i, 0)),   # LM hidden states
            const_spec((nin_p, nhid_p)),                          # embedding table
            const_spec((lm_hidden, nhid_p)),                      # LMEmbed.proj weight
            const_spec((1, nhid_p)),                              # LMEmbed.proj bias
            pl.BlockSpec((nhid_p, TN), lambda i, j: (0, j)),      # Linear.proj weight
            pl.BlockSpec((1, TN), lambda i, j: (0, j)),           # Linear.proj bias
        ]
        out_specs = pl.BlockSpec((TM, TN), lambda i, j: (i, j))
        return in_specs, out_specs

    def run(single_buffer_weights):
        in_specs, out_specs = build_specs(single_buffer_weights)
        grid_spec = pltpu.PrefetchScalarGridSpec(
            num_scalar_prefetch=0,
            grid=(grid_i, grid_j),
            in_specs=in_specs,
            out_specs=out_specs,
            scratch_shapes=[pltpu.VMEM((TM, nhid_p), jnp.bfloat16)],
        )
        return pl.pallas_call(
            _linear_lm_kernel,
            out_shape=jax.ShapeDtypeStruct((N, nout_p), out_dtype),
            grid_spec=grid_spec,
            compiler_params=pltpu.CompilerParams(
                # Row tiles independent -> megacore sharding; nout axis sequential
                # (h scratch is filled at j == 0 and reused).
                dimension_semantics=("parallel", "arbitrary"),
                vmem_limit_bytes=vmem_limit,
            ),
            cost_estimate=pl.CostEstimate(
                flops=flops, transcendentals=0, bytes_accessed=bytes_accessed),
        )(ids, hlm, tab_p, w1_p, b1_p, w2_p, b2_p)

    try:
        # Constant-index weight blocks don't need double buffering (VMEM win on v7x).
        z_pad = run(single_buffer_weights=True)
    except Exception:
        # pl.Buffered(1) / pipeline_mode unsupported on this JAX version -> defaults.
        z_pad = run(single_buffer_weights=False)

    z = z_pad if nout_p == nout else z_pad[:, :nout]
    return z.reshape(B, S, nout)


def init_params(key, nin, nhidden, nout, lm_hidden, padding_idx):
    k_emb, k_w1, k_b1, k_w2, k_b2 = jax.random.split(key, 5)

    # nn.Embedding default init: N(0, 1), padding_idx row zeroed.
    embed_table = jax.random.normal(k_emb, (nin, nhidden), dtype=jnp.float32)
    embed_table = embed_table.at[padding_idx].set(0.0)

    # nn.Linear default init: U(-1/sqrt(fan_in), 1/sqrt(fan_in))
    lim1 = 1.0 / (lm_hidden ** 0.5)
    w1 = jax.random.uniform(k_w1, (lm_hidden, nhidden), jnp.float32, -lim1, lim1)
    b1 = jax.random.uniform(k_b1, (1, nhidden), jnp.float32, -lim1, lim1)

    lim2 = 1.0 / (nhidden ** 0.5)
    w2 = jax.random.uniform(k_w2, (nhidden, nout), jnp.float32, -lim2, lim2)
    b2 = jax.random.uniform(k_b2, (1, nout), jnp.float32, -lim2, lim2)

    return embed_table, w1, b1, w2, b2


if __name__ == "__main__":
    # Small shapes consistent with the module's forward.
    B, S = 2, 8
    nin = 20                  # vocab size (padding_idx = nin - 1 = 19)
    nhidden = 32
    nout = 24
    lm_hidden = 48
    padding_idx = nin - 1

    key = jax.random.PRNGKey(0)
    k_params, k_x, k_lm = jax.random.split(key, 3)

    embed_table, w1, b1, w2, b2 = init_params(
        k_params, nin, nhidden, nout, lm_hidden, padding_idx
    )

    x = jax.random.randint(k_x, (B, S), 0, nin, dtype=jnp.int32)
    h_lm = jax.random.normal(k_lm, (B, S, lm_hidden), dtype=jnp.float32)

    z = linear_lm_forward(x, h_lm, embed_table, w1, b1, w2, b2)
    z = jax.block_until_ready(z)

    # Reference check in plain JAX (f32 math). Kernel uses bf16 matmul operands
    # with f32 accumulation, so tolerance is relaxed accordingly.
    emb_ref = jnp.take(embed_table, x.reshape(-1), axis=0)
    h_ref = jnp.maximum(emb_ref + h_lm.reshape(-1, lm_hidden) @ w1 + b1, 0.0)
    z_ref = (h_ref @ w2 + b2).reshape(B, S, nout)
    assert z.shape == (B, S, nout)
    assert jnp.allclose(z, z_ref, atol=3e-2, rtol=3e-2), float(jnp.max(jnp.abs(z - z_ref)))

    print("KERNEL_OK")
</pallas_src>

<mosaic_0001>
module attributes {stable_mosaic.version = 11 : i64} {
  func.func @_linear_lm_kernel(%arg0: i32, %arg1: i32, %arg2: memref<16x1xi32, #tpu.memory_space<vmem>>, %arg3: memref<16x48xf32, #tpu.memory_space<vmem>>, %arg4: memref<24x128xf32, #tpu.memory_space<vmem>>, %arg5: memref<48x128xbf16, #tpu.memory_space<vmem>>, %arg6: memref<1x128xf32, #tpu.memory_space<vmem>>, %arg7: memref<128x128xbf16, #tpu.memory_space<vmem>>, %arg8: memref<1x128xf32, #tpu.memory_space<vmem>>, %arg9: memref<16x128xf32, #tpu.memory_space<vmem>>, %arg10: memref<16x128xbf16, #tpu.memory_space<vmem>>) attributes {dimension_semantics = [#tpu.dimension_semantics<parallel>, #tpu.dimension_semantics<arbitrary>], iteration_bounds = array<i64: 1, 1>, scalar_prefetch = 0 : i64, scratch_operands = 1 : i64, tpu.core_type = #tpu.core_type<tc>, window_params = [{transform_indices = @transform_0, window_bounds = array<i64: 16, 1>}, {transform_indices = @transform_1, window_bounds = array<i64: 16, 48>}, {pipeline_mode = #tpu.pipeline_mode<synchronous>, transform_indices = @transform_2, window_bounds = array<i64: 24, 128>}, {pipeline_mode = #tpu.pipeline_mode<synchronous>, transform_indices = @transform_3, window_bounds = array<i64: 48, 128>}, {pipeline_mode = #tpu.pipeline_mode<synchronous>, transform_indices = @transform_4, window_bounds = array<i64: 1, 128>}, {transform_indices = @transform_5, window_bounds = array<i64: 128, 128>}, {transform_indices = @transform_6, window_bounds = array<i64: 1, 128>}, {transform_indices = @transform_7, window_bounds = array<i64: 16, 128>}]} {
    %c0_i32 = arith.constant 0 : i32
    %0 = arith.cmpi eq, %arg1, %c0_i32 : i32
    %1 = arith.extui %0 : i1 to i32
    %c0_i32_0 = arith.constant 0 : i32
    %2 = arith.cmpi ne, %1, %c0_i32_0 : i32
    scf.if %2 {
      %10 = tpu.iota {dimensions = array<i32: 1>} : vector<16x24xi32>
      %c0_8 = arith.constant 0 : index
      %c0_9 = arith.constant 0 : index
      %11 = vector.load %arg2[%c0_8, %c0_9] : memref<16x1xi32, #tpu.memory_space<vmem>>, vector<16x1xi32>
      %12 = vector.broadcast %11 : vector<16x1xi32> to vector<16x24xi32>
      %13 = arith.cmpi eq, %10, %12 : vector<16x24xi32>
      %14 = arith.extui %13 : vector<16x24xi1> to vector<16x24xi32>
      %15 = arith.sitofp %14 : vector<16x24xi32> to vector<16x24xf32>
      %c0_10 = arith.constant 0 : index
      %c0_11 = arith.constant 0 : index
      %16 = vector.load %arg4[%c0_10, %c0_11] : memref<24x128xf32, #tpu.memory_space<vmem>>, vector<24x128xf32>
      %cst_12 = arith.constant dense<0.000000e+00> : vector<16x128xf32>
      %17 = tpu.matmul %15, %16, %cst_12 {dimension_numbers = #tpu.dot_dimension_numbers<[1], [0], [0], [1], [0, 0, 1, 1], [], []>} : vector<16x24xf32>, vector<24x128xf32>, vector<16x128xf32> -> vector<16x128xf32>
      %c0_13 = arith.constant 0 : index
      %c0_14 = arith.constant 0 : index
      %18 = vector.load %arg3[%c0_13, %c0_14] : memref<16x48xf32, #tpu.memory_space<vmem>>, vector<16x48xf32>
      %19 = arith.truncf %18 : vector<16x48xf32> to vector<16x48xbf16>
      %c0_15 = arith.constant 0 : index
      %c0_16 = arith.constant 0 : index
      %20 = vector.load %arg5[%c0_15, %c0_16] : memref<48x128xbf16, #tpu.memory_space<vmem>>, vector<48x128xbf16>
      %cst_17 = arith.constant dense<0.000000e+00> : vector<16x128xf32>
      %21 = tpu.matmul %19, %20, %cst_17 {dimension_numbers = #tpu.dot_dimension_numbers<[1], [0], [0], [1], [0, 0, 1, 1], [], []>} : vector<16x48xbf16>, vector<48x128xbf16>, vector<16x128xf32> -> vector<16x128xf32>
      %c0_18 = arith.constant 0 : index
      %c0_19 = arith.constant 0 : index
      %22 = vector.load %arg6[%c0_18, %c0_19] : memref<1x128xf32, #tpu.memory_space<vmem>>, vector<1x128xf32>
      %23 = vector.broadcast %22 : vector<1x128xf32> to vector<16x128xf32>
      %24 = arith.addf %21, %23 : vector<16x128xf32>
      %25 = arith.addf %17, %24 : vector<16x128xf32>
      %cst_20 = arith.constant 0.000000e+00 : f32
      %26 = vector.broadcast %cst_20 : f32 to vector<16x128xf32>
      %27 = arith.maximumf %25, %26 : vector<16x128xf32>
      %28 = arith.truncf %27 : vector<16x128xf32> to vector<16x128xbf16>
      %c0_21 = arith.constant 0 : index
      %c0_22 = arith.constant 0 : index
      %29 = vector.load %arg10[%c0_21, %c0_22] : memref<16x128xbf16, #tpu.memory_space<vmem>>, vector<16x128xbf16>
      tpu.vector_store %arg10[%c0_21, %c0_22], %28 {strides = array<i32>} : memref<16x128xbf16, #tpu.memory_space<vmem>>, vector<16x128xbf16>,
    } else {
    }
    %c0 = arith.constant 0 : index
    %c0_1 = arith.constant 0 : index
    %3 = vector.load %arg10[%c0, %c0_1] : memref<16x128xbf16, #tpu.memory_space<vmem>>, vector<16x128xbf16>
    %c0_2 = arith.constant 0 : index
    %c0_3 = arith.constant 0 : index
    %4 = vector.load %arg7[%c0_2, %c0_3] : memref<128x128xbf16, #tpu.memory_space<vmem>>, vector<128x128xbf16>
    %cst = arith.constant dense<0.000000e+00> : vector<16x128xf32>
    %5 = tpu.matmul %3, %4, %cst {dimension_numbers = #tpu.dot_dimension_numbers<[1], [0], [0], [1], [0, 0, 1, 1], [], []>} : vector<16x128xbf16>, vector<128x128xbf16>, vector<16x128xf32> -> vector<16x128xf32>
    %c0_4 = arith.constant 0 : index
    %c0_5 = arith.constant 0 : index
    %6 = vector.load %arg8[%c0_4, %c0_5] : memref<1x128xf32, #tpu.memory_space<vmem>>, vector<1x128xf32>
    %7 = vector.broadcast %6 : vector<1x128xf32> to vector<16x128xf32>
    %8 = arith.addf %5, %7 : vector<16x128xf32>
    %c0_6 = arith.constant 0 : index
    %c0_7 = arith.constant 0 : index
    %9 = vector.load %arg9[%c0_6, %c0_7] : memref<16x128xf32, #tpu.memory_space<vmem>>, vector<16x128xf32>
    tpu.vector_store %arg9[%c0_6, %c0_7], %8 {strides = array<i32>} : memref<16x128xf32, #tpu.memory_space<vmem>>, vector<16x128xf32>,
    return
  }
  func.func @transform_0(%arg0: i32, %arg1: i32) -> (i32, i32) {
    %c0_i32 = arith.constant 0 : i32
    %c0_i32_0 = arith.constant 0 : i32
    return %arg0, %c0_i32 : i32, i32
  }
  func.func @transform_1(%arg0: i32, %arg1: i32) -> (i32, i32) {
    %c0_i32 = arith.constant 0 : i32
    %c0_i32_0 = arith.constant 0 : i32
    return %arg0, %c0_i32 : i32, i32
  }
  func.func @transform_2(%arg0: i32, %arg1: i32) -> (i32, i32) {
    %c0_i32 = arith.constant 0 : i32
    %c0_i32_0 = arith.constant 0 : i32
    %c0_i32_1 = arith.constant 0 : i32
    return %c0_i32, %c0_i32_0 : i32, i32
  }
  func.func @transform_3(%arg0: i32, %arg1: i32) -> (i32, i32) {
    %c0_i32 = arith.constant 0 : i32
    %c0_i32_0 = arith.constant 0 : i32
    %c0_i32_1 = arith.constant 0 : i32
    return %c0_i32, %c0_i32_0 : i32, i32
  }
  func.func @transform_4(%arg0: i32, %arg1: i32) -> (i32, i32) {
    %c0_i32 = arith.constant 0 : i32
    %c0_i32_0 = arith.constant 0 : i32
    %c0_i32_1 = arith.constant 0 : i32
    return %c0_i32, %c0_i32_0 : i32, i32
  }
  func.func @transform_5(%arg0: i32, %arg1: i32) -> (i32, i32) {
    %c0_i32 = arith.constant 0 : i32
    %c0_i32_0 = arith.constant 0 : i32
    return %c0_i32, %arg1 : i32, i32
  }
  func.func @transform_6(%arg0: i32, %arg1: i32) -> (i32, i32) {
    %c0_i32 = arith.constant 0 : i32
    %c0_i32_0 = arith.constant 0 : i32
    return %c0_i32, %arg1 : i32, i32
  }
  func.func @transform_7(%arg0: i32, %arg1: i32) -> (i32, i32) {
    %c0_i32 = arith.constant 0 : i32
    return %arg0, %arg1 : i32, i32
  }
}

module attributes {stable_mosaic.version = 11 : i64} {
  func.func @_linear_lm_kernel(%arg0: i32, %arg1: i32, %arg2: memref<16x1xi32, #tpu.memory_space<vmem>>, %arg3: memref<16x48xf32, #tpu.memory_space<vmem>>, %arg4: memref<24x128xf32, #tpu.memory_space<vmem>>, %arg5: memref<48x128xbf16, #tpu.memory_space<vmem>>, %arg6: memref<1x128xf32, #tpu.memory_space<vmem>>, %arg7: memref<128x128xbf16, #tpu.memory_space<vmem>>, %arg8: memref<1x128xf32, #tpu.memory_space<vmem>>, %arg9: memref<16x128xf32, #tpu.memory_space<vmem>>, %arg10: memref<16x128xbf16, #tpu.memory_space<vmem>>) attributes {dimension_semantics = [#tpu.dimension_semantics<parallel>, #tpu.dimension_semantics<arbitrary>], iteration_bounds = array<i64: 1, 1>, scalar_prefetch = 0 : i64, scratch_operands = 1 : i64, tpu.core_type = #tpu.core_type<tc>, window_params = [{transform_indices = @transform_0, window_bounds = array<i64: 16, 1>}, {transform_indices = @transform_1, window_bounds = array<i64: 16, 48>}, {pipeline_mode = #tpu.pipeline_mode<synchronous>, transform_indices = @transform_2, window_bounds = array<i64: 24, 128>}, {pipeline_mode = #tpu.pipeline_mode<synchronous>, transform_indices = @transform_3, window_bounds = array<i64: 48, 128>}, {pipeline_mode = #tpu.pipeline_mode<synchronous>, transform_indices = @transform_4, window_bounds = array<i64: 1, 128>}, {transform_indices = @transform_5, window_bounds = array<i64: 128, 128>}, {transform_indices = @transform_6, window_bounds = array<i64: 1, 128>}, {transform_indices = @transform_7, window_bounds = array<i64: 16, 128>}]} {
    %c0_i32 = arith.constant 0 : i32
    %0 = arith.cmpi eq, %arg1, %c0_i32 : i32
    %1 = arith.extui %0 : i1 to i32
    %c0_i32_0 = arith.constant 0 : i32
    %2 = arith.cmpi ne, %1, %c0_i32_0 : i32
    scf.if %2 {
      %10 = tpu.iota {dimensions = array<i32: 1>} : vector<16x24xi32>
      %c0_8 = arith.constant 0 : index
      %c0_9 = arith.constant 0 : index
      %11 = vector.load %arg2[%c0_8, %c0_9] : memref<16x1xi32, #tpu.memory_space<vmem>>, vector<16x1xi32>
      %12 = vector.broadcast %11 : vector<16x1xi32> to vector<16x24xi32>
      %13 = arith.cmpi eq, %10, %12 : vector<16x24xi32>
      %14 = arith.extui %13 : vector<16x24xi1> to vector<16x24xi32>
      %15 = arith.sitofp %14 : vector<16x24xi32> to vector<16x24xf32>
      %c0_10 = arith.constant 0 : index
      %c0_11 = arith.constant 0 : index
      %16 = vector.load %arg4[%c0_10, %c0_11] : memref<24x128xf32, #tpu.memory_space<vmem>>, vector<24x128xf32>
      %cst_12 = arith.constant dense<0.000000e+00> : vector<16x128xf32>
      %17 = tpu.matmul %15, %16, %cst_12 {dimension_numbers = #tpu.dot_dimension_numbers<[1], [0], [0], [1], [0, 0, 1, 1], [], []>} : vector<16x24xf32>, vector<24x128xf32>, vector<16x128xf32> -> vector<16x128xf32>
      %c0_13 = arith.constant 0 : index
      %c0_14 = arith.constant 0 : index
      %18 = vector.load %arg3[%c0_13, %c0_14] : memref<16x48xf32, #tpu.memory_space<vmem>>, vector<16x48xf32>
      %19 = arith.truncf %18 : vector<16x48xf32> to vector<16x48xbf16>
      %c0_15 = arith.constant 0 : index
      %c0_16 = arith.constant 0 : index
      %20 = vector.load %arg5[%c0_15, %c0_16] : memref<48x128xbf16, #tpu.memory_space<vmem>>, vector<48x128xbf16>
      %cst_17 = arith.constant dense<0.000000e+00> : vector<16x128xf32>
      %21 = tpu.matmul %19, %20, %cst_17 {dimension_numbers = #tpu.dot_dimension_numbers<[1], [0], [0], [1], [0, 0, 1, 1], [], []>} : vector<16x48xbf16>, vector<48x128xbf16>, vector<16x128xf32> -> vector<16x128xf32>
      %c0_18 = arith.constant 0 : index
      %c0_19 = arith.constant 0 : index
      %22 = vector.load %arg6[%c0_18, %c0_19] : memref<1x128xf32, #tpu.memory_space<vmem>>, vector<1x128xf32>
      %23 = vector.broadcast %22 : vector<1x128xf32> to vector<16x128xf32>
      %24 = arith.addf %21, %23 : vector<16x128xf32>
      %25 = arith.addf %17, %24 : vector<16x128xf32>
      %cst_20 = arith.constant 0.000000e+00 : f32
      %26 = vector.broadcast %cst_20 : f32 to vector<16x128xf32>
      %27 = arith.maximumf %25, %26 : vector<16x128xf32>
      %28 = arith.truncf %27 : vector<16x128xf32> to vector<16x128xbf16>
      %c0_21 = arith.constant 0 : index
      %c0_22 = arith.constant 0 : index
      %29 = vector.load %arg10[%c0_21, %c0_22] : memref<16x128xbf16, #tpu.memory_space<vmem>>, vector<16x128xbf16>
      tpu.vector_store %arg10[%c0_21, %c0_22], %28 {strides = array<i32>} : memref<16x128xbf16, #tpu.memory_space<vmem>>, vector<16x128xbf16>,
    } else {
    }
    %c0 = arith.constant 0 : index
    %c0_1 = arith.constant 0 : index
    %3 = vector.load %arg10[%c0, %c0_1] : memref<16x128xbf16, #tpu.memory_space<vmem>>, vector<16x128xbf16>
    %c0_2 = arith.constant 0 : index
    %c0_3 = arith.constant 0 : index
    %4 = vector.load %arg7[%c0_2, %c0_3] : memref<128x128xbf16, #tpu.memory_space<vmem>>, vector<128x128xbf16>
    %cst = arith.constant dense<0.000000e+00> : vector<16x128xf32>
    %5 = tpu.matmul %3, %4, %cst {dimension_numbers = #tpu.dot_dimension_numbers<[1], [0], [0], [1], [0, 0, 1, 1], [], []>} : vector<16x128xbf16>, vector<128x128xbf16>, vector<16x128xf32> -> vector<16x128xf32>
    %c0_4 = arith.constant 0 : index
    %c0_5 = arith.constant 0 : index
    %6 = vector.load %arg8[%c0_4, %c0_5] : memref<1x128xf32, #tpu.memory_space<vmem>>, vector<1x128xf32>
    %7 = vector.broadcast %6 : vector<1x128xf32> to vector<16x128xf32>
    %8 = arith.addf %5, %7 : vector<16x128xf32>
    %c0_6 = arith.constant 0 : index
    %c0_7 = arith.constant 0 : index
    %9 = vector.load %arg9[%c0_6, %c0_7] : memref<16x128xf32, #tpu.memory_space<vmem>>, vector<16x128xf32>
    tpu.vector_store %arg9[%c0_6, %c0_7], %8 {strides = array<i32>} : memref<16x128xf32, #tpu.memory_space<vmem>>, vector<16x128xf32>,
    return
  }
  func.func @transform_0(%arg0: i32, %arg1: i32) -> (i32, i32) {
    %c0_i32 = arith.constant 0 : i32
    %c0_i32_0 = arith.constant 0 : i32
    return %arg0, %c0_i32 : i32, i32
  }
  func.func @transform_1(%arg0: i32, %arg1: i32) -> (i32, i32) {
    %c0_i32 = arith.constant 0 : i32
    %c0_i32_0 = arith.constant 0 : i32
    return %arg0, %c0_i32 : i32, i32
  }
  func.func @transform_2(%arg0: i32, %arg1: i32) -> (i32, i32) {
    %c0_i32 = arith.constant 0 : i32
    %c0_i32_0 = arith.constant 0 : i32
    %c0_i32_1 = arith.constant 0 : i32
    return %c0_i32, %c0_i32_0 : i32, i32
  }
  func.func @transform_3(%arg0: i32, %arg1: i32) -> (i32, i32) {
    %c0_i32 = arith.constant 0 : i32
    %c0_i32_0 = arith.constant 0 : i32
    %c0_i32_1 = arith.constant 0 : i32
    return %c0_i32, %c0_i32_0 : i32, i32
  }
  func.func @transform_4(%arg0: i32, %arg1: i32) -> (i32, i32) {
    %c0_i32 = arith.constant 0 : i32
    %c0_i32_0 = arith.constant 0 : i32
    %c0_i32_1 = arith.constant 0 : i32
    return %c0_i32, %c0_i32_0 : i32, i32
  }
  func.func @transform_5(%arg0: i32, %arg1: i32) -> (i32, i32) {
    %c0_i32 = arith.constant 0 : i32
    %c0_i32_0 = arith.constant 0 : i32
    return %c0_i32, %arg1 : i32, i32
  }
  func.func @transform_6(%arg0: i32, %arg1: i32) -> (i32, i32) {
    %c0_i32 = arith.constant 0 : i32
    %c0_i32_0 = arith.constant 0 : i32
    return %c0_i32, %arg1 : i32, i32
  }
  func.func @transform_7(%arg0: i32, %arg1: i32) -> (i32, i32) {
    %c0_i32 = arith.constant 0 : i32
    return %arg0, %arg1 : i32, i32
  }
}

</mosaic_0001>

<bundles_post_ra>
// kernel: tpu_custom_call.1
= control target key start
LH: loop header
LB: loop body
LE: loop exit
PB: predicated region body
PF: predicated region fallthrough
CT: control target
= control target key end

     0   :  { %12 = vsyncpa [#allocation4], 0  ;;  %s718_s0 = inlined_call_operand.vmem [shape: s32[16,1], index: 0, kind: input, shape index: {}]   ;;  %s719_s1 = inlined_call_operand.hbm [shape: f32[16,48], index: 1, kind: input, shape index: {}]   ;;  %s720_s2 = inlined_call_operand.vmem [shape: f32[24,128], index: 2, kind: input, shape index: {}]   ;;  %s721_s3 = inlined_call_operand.hbm [shape: bf16[48,128], index: 3, kind: input, shape index: {}]   ;;  %s722_s4 = inlined_call_operand.vmem [shape: f32[1,128], index: 4, kind: input, shape index: {}]   ;;  %s723_s5 = inlined_call_operand.hbm [shape: bf16[128,128], index: 5, kind: input, shape index: {}]   ;;  %s724_s6 = inlined_call_operand.vmem [shape: f32[1,128], index: 6, kind: input, shape index: {}]   ;;  %s725_s7 = inlined_call_operand.hbm [shape: f32[16,128], index: 7, kind: output, shape index: {}]  }
   0x1   :  { %13 = vsyncpa [#allocation7], 0 }
   0x2   :  { %14 = vsyncpa [#allocation5], 0  ;;  %s586_s24 = smov [#allocation6]   ;;  %s492_s28 = scalar_lea.hbm %s721_s3, 384 }
   0x3   :  { %s36_s25 = sshll.u32 %s586_s24, 4  ;;  %p493_p0 = scmp.ne.s32.totalorder %s721_s3, %s492_s28  ;;  %s37_s25 = int_to_ptr.vmem [resolvable:$true] %s36_s25 }
   0x4   :  { %p496_p1 = scmp.lt.u32.totalorder %s492_s28, %s721_s3 }
   0x6   :  { %p498_p2 = pnand %p496_p1, %p493_p0 }
   0x8   :  { %501 = shalt.err (!%p498_p2)
}
   0x9   :  { %s502_s10 = scalar_lea.vmem %s37_s25, 384  ;;  %p507_p4 = scmp.lt.s32.totalorder %s37_s25, %s37_s25 }
   0xa   :  { %p503_p3 = scmp.ne.s32.totalorder %s37_s25, %s502_s10  ;;  %p508_p5 = scmp.lt.s32.totalorder %s502_s10, %s502_s10 }
   0xc   :  { %p509_p6 = por %p508_p5, %p507_p4 }
   0xe   :  { %p510_p7 = pnand %p509_p6, %p503_p3 }
  0x10   :  { %513 = shalt.err (!%p510_p7)
}
  0x11   :  { %s587_s11 = smov 64   ;;  %s588_s12 = smov 4  }
  0x12   :  { %42 = dma.hbm_to_vmem [thread:$0]  %s721_s3, 384, %s37_s25, [#allocation7], %s587_s11, %s587_s11, %s588_s12  }
  0x13   :  { %s589_s15 = smov [#allocation3]   ;;  %s514_s19 = scalar_lea.hbm %s719_s1, 256 }
  0x14   :  { %s22_s16 = sshll.u32 %s589_s15, 4  ;;  %p515_p8 = scmp.ne.s32.totalorder %s719_s1, %s514_s19  ;;  %s23_s16 = int_to_ptr.vmem [resolvable:$true] %s22_s16 }
  0x15   :  { %p518_p9 = scmp.lt.u32.totalorder %s514_s19, %s719_s1 }
  0x17   :  { %p520_p10 = pnand %p518_p9, %p515_p8 }
  0x19   :  { %523 = shalt.err (!%p520_p10)
}
  0x1a   :  { %s524_s24 = scalar_lea.vmem %s23_s16, 256  ;;  %p529_p12 = scmp.lt.s32.totalorder %s23_s16, %s23_s16 }
  0x1b   :  { %p525_p11 = scmp.ne.s32.totalorder %s23_s16, %s524_s24  ;;  %p530_p13 = scmp.lt.s32.totalorder %s524_s24, %s524_s24 }
  0x1d   :  { %p531_p0 = por %p530_p13, %p529_p12 }
  0x1f   :  { %p532_p1 = pnand %p531_p0, %p525_p11 }
  0x21   :  { %535 = shalt.err (!%p532_p1)
}
  0x22   :  { %s590_s3 = smov 128   ;;  %s591_s25 = smov 8  }
  0x23   :  { %28 = dma.hbm_to_vmem [thread:$0]  %s719_s1, 256, %s23_s16, [#allocation4], %s590_s3, %s590_s3, %s591_s25  }
  0x24   :  { %s592_s28 = smov [#allocation8]   ;;  %s536_s9 = scalar_lea.hbm %s723_s5, 1024 }
  0x25   :  { %s50_s29 = sshll.u32 %s592_s28, 4  ;;  %p537_p2 = scmp.ne.s32.totalorder %s723_s5, %s536_s9  ;;  %s51_s29 = int_to_ptr.vmem [resolvable:$true] %s50_s29 }
  0x26   :  { %p540_p3 = scmp.lt.u32.totalorder %s536_s9, %s723_s5 }
  0x28   :  { %p542_p4 = pnand %p540_p3, %p537_p2 }
  0x2a   :  { %545 = shalt.err (!%p542_p4)
}
  0x2b   :  { %s546_s17 = scalar_lea.vmem %s51_s29, 1024  ;;  %p551_p6 = scmp.lt.s32.totalorder %s51_s29, %s51_s29 }
  0x2c   :  { %p547_p5 = scmp.ne.s32.totalorder %s51_s29, %s546_s17  ;;  %p552_p7 = scmp.lt.s32.totalorder %s546_s17, %s546_s17 }
  0x2e   :  { %p553_p8 = por %p552_p7, %p551_p6 }
  0x30   :  { %p554_p9 = pnand %p553_p8, %p547_p5 }
  0x32   :  { %557 = shalt.err (!%p554_p9)
}
  0x33   :  { %56 = dma.hbm_to_vmem [thread:$0]  %s723_s5, 1024, %s51_s29, [#allocation7], %s587_s11, %s587_s11, %s588_s12  }
  0x34   :  { %580 = dma.done.wait [#allocation4], 256  }
  0x35   :  { %581 = vsyncadd [#allocation4], 4294967040 }
  0x36   :  { %582 = dma.done.wait [#allocation7], 1408  }
  0x37   :  { %583 = vsyncadd [#allocation7], 4294965888  ;;  %v593_v0 = vmov 0   ;;  %v594_v1 = vmov 0.0   ;;  %vm595_vm0 = vmmov 0   ;;  %v75_v2 = vld [vmem:[%s718_s0] sm:$0xff]  ;;  %v73_v20 = vlaneseq }
  0x38   :  { %480 = vset.pattern.permute.xlu0 %v593_v0  ;;  %426 = vmatprep.subr.bf16.mxu0 %v594_v1  ;;  %v481_v3 = vld [vmem:[#allocation6] sm:$0xff]   ;;  %v482_v5 = vld [vmem:[#allocation6 + $0x8] sm:$0xff]   ;;  %v89_v6 = vld [vmem:[%s720_s2] sm:$0xff]  ;;  %vm126_vm1 = vcmask 392192   ;;  %vm171_vm2 = vcmask 195584   ;;  %s596_s28 = smov [#allocation9]  }
  0x39   :  { %432 = vmatprep.mubr.msk.bf16.mxu0 %vm595_vm0, %v594_v1  ;;  %445 = vmatprep.subr.bf16.mxu1 %v594_v1  ;;  %v76_v4 = vld [vmem:[%s718_s0 + $0x8] sm:$0xff]  ;;  %v483_v7 = vld [vmem:[#allocation6 + $0x10] sm:$0xff]   ;;  %v93_v10 = vld [vmem:[#allocation3 + $0x8] sm:$0xff]  ;;  %v74_v21 = vand.u32 127, %v73_v20  ;;  %s377_s29 = sshll.u32 %s596_s28, 4  ;;  %s378_s29 = int_to_ptr.vmem [resolvable:$true] %s377_s29 }
  0x3a   :  { %461 = vmatprep.mubr.msk.bf16.mxu1 %vm595_vm0, %v594_v1  ;;  %78 = vperm.xlu0 %480, %v75_v2   ;;  %v92_v8 = vld [vmem:[#allocation3] sm:$0xff]  ;;  %v90_v9 = vld [vmem:[%s720_s2 + $0x8] sm:$0xff]  ;;  %v484_v11 = vld [vmem:[#allocation8] sm:$0xff]   ;;  %p563_p11 = scmp.lt.s32.totalorder %s378_s29, %s378_s29 }
  0x3b   :  { %427 = vmatpush3.bf16.msra.mxu0 %v481_v3  ;;  %v465_v12 = vpack.c.bf16 %v90_v9, %v89_v6  ;;  %v485_v13 = vld [vmem:[#allocation8 + $0x8] sm:$0xff]   ;;  %446 = vmatpush3.bf16.msra.mxu1 %v484_v11  ;;  %v94_v14 = vpack.c.bf16 %v93_v10, %v92_v8  ;;  %v91_v15 = vld [vmem:[%s720_s2 + $0x10] sm:$0xff]  ;;  %v487_v17 = vld [vmem:[#allocation8 + $0x18] sm:$0xff]  }
  0x3c   :  { %428 = vmatprep.subr.bf16.mxu0 %v594_v1  ;;  %447 = vmatprep.subr.bf16.mxu1 %v594_v1  ;;  %v486_v16 = vld [vmem:[#allocation8 + $0x10] sm:$0xff]   ;;  %v488_v18 = vld [vmem:[#allocation8 + $0x20] sm:$0xff]   ;;  %v489_v19 = vld [vmem:[#allocation8 + $0x28] sm:$0xff]  }
  0x3d   :  { %v490_v26 = vld [vmem:[#allocation8 + $0x30] sm:$0xff]   ;;  %v491_v27 = vld [vmem:[#allocation8 + $0x38] sm:$0xff]   ;;  %v392_v32 = vld [vmem:[%s722_s4] ss:$0 sm:$0xff]  ;;  %s558_s4 = scalar_lea.vmem %s378_s29, 256 }
  0x3e   :  { %81 = vperm.xlu0 %480, %v76_v4   ;;  %v399_v42 = vld [vmem:[%s724_s6] ss:$0 sm:$0xff]  ;;  %p559_p10 = scmp.ne.s32.totalorder %s378_s29, %s558_s4  ;;  %p564_p12 = scmp.lt.s32.totalorder %s558_s4, %s558_s4 }
  0x3f   :  { %429 = vmatpush3.bf16.msra.mxu0 %v482_v5  ;;  %448 = vmatpush3.bf16.msra.mxu1 %v485_v13 }
  0x40   :  { %430 = vmatprep.subr.bf16.mxu0 %v594_v1  ;;  %449 = vmatprep.subr.bf16.mxu1 %v594_v1  ;;  %p565_p13 = por %p564_p12, %p563_p11 }
  0x42   :  { %p566_p0 = pnand %p565_p13, %p559_p10 }
  0x43   :  { %431 = vmatpush3.bf16.msra.mxu0 %v483_v7  ;;  %450 = vmatpush3.bf16.msra.mxu1 %v486_v16 }
  0x44   :  { %466 = vmatprep.subr.bf16.mxu0 %v465_v12  ;;  %451 = vmatprep.subr.bf16.mxu1 %v594_v1 }
  0x46   :  { %433 = vmatmul.mubr.msk.bf16.vlgmr.msra.gmra.mrb[0].mxu0 %vm126_vm1, %v94_v14 }
  0x47   :  { %468 = vmatpush3.bf16.msra.mxu0 %v465_v12  ;;  %452 = vmatpush3.bf16.msra.mxu1 %v487_v17 }
  0x48   :  { %440 = vmatprep.subr.mxu0 %v91_v15  ;;  %453 = vmatprep.subr.bf16.mxu1 %v594_v1 }
  0x4b   :  { %441 = vmatpush3.msra.mxu0 %v91_v15  ;;  %454 = vmatpush3.bf16.msra.mxu1 %v488_v18 }
  0x4c   :  { %455 = vmatprep.subr.bf16.mxu1 %v594_v1 }
  0x4f   :  { %456 = vmatpush3.bf16.msra.mxu1 %v489_v19 }
  0x50   :  { %457 = vmatprep.subr.bf16.mxu1 %v594_v1 }
  0x53   :  { %458 = vmatpush3.bf16.msra.mxu1 %v490_v26 }
  0x54   :  { %459 = vmatprep.subr.bf16.mxu1 %v594_v1 }
  0x57   :  { %460 = vmatpush3.bf16.msra.mxu1 %v491_v27 }
  0xb9   :  { %v79_v22 = vpop.permute.xlu0 %78 }
  0xba   :  { %vm83_vm3 = vcmp.eq.s32.totalorder %v74_v21, %v79_v22 }
  0xbb   :  { %v390_v23 = vsel %vm83_vm3, 1.0, %v594_v1 }
  0xbc   :  { %442 = vmatprep.mubr.msk.f32.mxu0 %vm171_vm2, %v390_v23 }
  0xbd   :  { %v82_v24 = vpop.permute.xlu0 %81 }
  0xbe   :  { %vm84_vm4 = vcmp.eq.s32.totalorder %v74_v21, %v82_v24 }
  0xbf   :  { %v391_v25 = vsel %vm84_vm4, 1.0, %v594_v1 }
  0xc0   :  { %443 = vmatmul.mubr.msk.f32.vlgmr.msra.gmra.mrb[4].mxu0 %vm171_vm2, %v391_v25 }
 0x119   :  { %v164_v28 = vpop.f32.mrb[0].mxu0 }
 0x11a   :  { %v434_v29 = vpop.f32.mrb[1].mxu0  ;;  %v165_v34 = vadd.f32 %v392_v32, %v164_v28 }
 0x11b   :  { %v167_v30 = vpop.f32.mrb[2].mxu0 }
 0x11c   :  { %v435_v31 = vpop.f32.mrb[3].mxu0  ;;  %v168_v33 = vadd.f32 %v392_v32, %v167_v30 }
 0x193   :  { %v444_v35 = vpop.f32.mrb[4].mxu0 }
 0x194   :  { %v250_v36 = vadd.f32 %v444_v35, %v168_v33  ;;  %v244_v37 = vpop.f32.mrb[5].mxu0 }
 0x195   :  { %v245_v38 = vadd.f32 %v244_v37, %v165_v34 }
 0x196   :  { %v254_v39 = vmax.f32 %v250_v36, 0.0 }
 0x197   :  { %v253_v40 = vmax.f32 %v245_v38, 0.0 }
 0x199   :  { %v255_v41 = vpack.c.bf16 %v254_v39, %v253_v40 }
 0x19b   :  { %462 = vmatmul.mubr.bf16.vlgmr.msra.gmra.mrb[0].mxu1 %v255_v41 }
 0x26e   :  { %v363_v43 = vpop.f32.mrb[0].mxu1 }
 0x26f   :  { %v364_v44 = vadd.f32 %v399_v42, %v363_v43  ;;  %v463_v45 = vpop.f32.mrb[1].mxu1 }
 0x270   :  { %v366_v46 = vpop.f32.mrb[2].mxu1 }
 0x271   :  { %370 = vst [vmem:[#allocation9] sm:$0xff] %v364_v44  ;;  %v367_v47 = vadd.f32 %v399_v42, %v366_v46  ;;  %v464_v48 = vpop.f32.mrb[3].mxu1 }
 0x273   :  { %371 = vst [vmem:[#allocation9 + $0x8] sm:$0xff] %v367_v47 }
 0x274   :  { %569 = shalt.err (!%p566_p0)
}
 0x275   :  { %s570_s8 = scalar_lea.hbm %s725_s7, 256 }
 0x276   :  { %p571_p1 = scmp.ne.s32.totalorder %s725_s7, %s570_s8  ;;  %p574_p2 = scmp.lt.u32.totalorder %s570_s8, %s725_s7 }
 0x278   :  { %p576_p3 = pnand %p574_p2, %p571_p1 }
 0x27a   :  { %579 = shalt.err (!%p576_p3)
}
 0x27b   :  { %383 = dma.vmem_to_hbm [thread:$0]  %s378_s29, 256, %s725_s7, [#allocation5], %s590_s3, %s590_s3, %s591_s25  }
 0x27c   :  { %584 = dma.done.wait [#allocation5], 256  }
 0x27d   :  { %585 = vsyncadd [#allocation5], 4294967040 }
 0x27e   :  { %387 = vsyncpa [#allocation4], 1 }
 0x27f   :  { %388 = vsyncpa [#allocation7], 1 }
 0x280   :  { %389 = vsyncpa [#allocation5], 1 }

// kernel: tpu_custom_call.1
= control target key start
LH: loop header
LB: loop body
LE: loop exit
PB: predicated region body
PF: predicated region fallthrough
CT: control target
= control target key end

     0   :  { %12 = vsyncpa [#allocation4], 0  ;;  %s718_s0 = inlined_call_operand.vmem [shape: s32[16,1], index: 0, kind: input, shape index: {}]   ;;  %s719_s1 = inlined_call_operand.hbm [shape: f32[16,48], index: 1, kind: input, shape index: {}]   ;;  %s720_s2 = inlined_call_operand.vmem [shape: f32[24,128], index: 2, kind: input, shape index: {}]   ;;  %s721_s3 = inlined_call_operand.hbm [shape: bf16[48,128], index: 3, kind: input, shape index: {}]   ;;  %s722_s4 = inlined_call_operand.vmem [shape: f32[1,128], index: 4, kind: input, shape index: {}]   ;;  %s723_s5 = inlined_call_operand.hbm [shape: bf16[128,128], index: 5, kind: input, shape index: {}]   ;;  %s724_s6 = inlined_call_operand.vmem [shape: f32[1,128], index: 6, kind: input, shape index: {}]   ;;  %s725_s7 = inlined_call_operand.hbm [shape: f32[16,128], index: 7, kind: output, shape index: {}]  }
   0x1   :  { %13 = vsyncpa [#allocation7], 0 }
   0x2   :  { %14 = vsyncpa [#allocation5], 0  ;;  %s586_s24 = smov [#allocation6]   ;;  %s492_s28 = scalar_lea.hbm %s721_s3, 384 }
   0x3   :  { %s36_s25 = sshll.u32 %s586_s24, 4  ;;  %p493_p0 = scmp.ne.s32.totalorder %s721_s3, %s492_s28  ;;  %s37_s25 = int_to_ptr.vmem [resolvable:$true] %s36_s25 }
   0x4   :  { %p496_p1 = scmp.lt.u32.totalorder %s492_s28, %s721_s3 }
   0x6   :  { %p498_p2 = pnand %p496_p1, %p493_p0 }
   0x8   :  { %501 = shalt.err (!%p498_p2)
}
   0x9   :  { %s502_s10 = scalar_lea.vmem %s37_s25, 384  ;;  %p507_p4 = scmp.lt.s32.totalorder %s37_s25, %s37_s25 }
   0xa   :  { %p503_p3 = scmp.ne.s32.totalorder %s37_s25, %s502_s10  ;;  %p508_p5 = scmp.lt.s32.totalorder %s502_s10, %s502_s10 }
   0xc   :  { %p509_p6 = por %p508_p5, %p507_p4 }
   0xe   :  { %p510_p7 = pnand %p509_p6, %p503_p3 }
  0x10   :  { %513 = shalt.err (!%p510_p7)
}
  0x11   :  { %s587_s11 = smov 64   ;;  %s588_s12 = smov 4  }
  0x12   :  { %42 = dma.hbm_to_vmem [thread:$0]  %s721_s3, 384, %s37_s25, [#allocation7], %s587_s11, %s587_s11, %s588_s12  }
  0x13   :  { %s589_s15 = smov [#allocation3]   ;;  %s514_s19 = scalar_lea.hbm %s719_s1, 256 }
  0x14   :  { %s22_s16 = sshll.u32 %s589_s15, 4  ;;  %p515_p8 = scmp.ne.s32.totalorder %s719_s1, %s514_s19  ;;  %s23_s16 = int_to_ptr.vmem [resolvable:$true] %s22_s16 }
  0x15   :  { %p518_p9 = scmp.lt.u32.totalorder %s514_s19, %s719_s1 }
  0x17   :  { %p520_p10 = pnand %p518_p9, %p515_p8 }
  0x19   :  { %523 = shalt.err (!%p520_p10)
}
  0x1a   :  { %s524_s24 = scalar_lea.vmem %s23_s16, 256  ;;  %p529_p12 = scmp.lt.s32.totalorder %s23_s16, %s23_s16 }
  0x1b   :  { %p525_p11 = scmp.ne.s32.totalorder %s23_s16, %s524_s24  ;;  %p530_p13 = scmp.lt.s32.totalorder %s524_s24, %s524_s24 }
  0x1d   :  { %p531_p0 = por %p530_p13, %p529_p12 }
  0x1f   :  { %p532_p1 = pnand %p531_p0, %p525_p11 }
  0x21   :  { %535 = shalt.err (!%p532_p1)
}
  0x22   :  { %s590_s3 = smov 128   ;;  %s591_s25 = smov 8  }
  0x23   :  { %28 = dma.hbm_to_vmem [thread:$0]  %s719_s1, 256, %s23_s16, [#allocation4], %s590_s3, %s590_s3, %s591_s25  }
  0x24   :  { %s592_s28 = smov [#allocation8]   ;;  %s536_s9 = scalar_lea.hbm %s723_s5, 1024 }
  0x25   :  { %s50_s29 = sshll.u32 %s592_s28, 4  ;;  %p537_p2 = scmp.ne.s32.totalorder %s723_s5, %s536_s9  ;;  %s51_s29 = int_to_ptr.vmem [resolvable:$true] %s50_s29 }
  0x26   :  { %p540_p3 = scmp.lt.u32.totalorder %s536_s9, %s723_s5 }
  0x28   :  { %p542_p4 = pnand %p540_p3, %p537_p2 }
  0x2a   :  { %545 = shalt.err (!%p542_p4)
}
  0x2b   :  { %s546_s17 = scalar_lea.vmem %s51_s29, 1024  ;;  %p551_p6 = scmp.lt.s32.totalorder %s51_s29, %s51_s29 }
  0x2c   :  { %p547_p5 = scmp.ne.s32.totalorder %s51_s29, %s546_s17  ;;  %p552_p7 = scmp.lt.s32.totalorder %s546_s17, %s546_s17 }
  0x2e   :  { %p553_p8 = por %p552_p7, %p551_p6 }
  0x30   :  { %p554_p9 = pnand %p553_p8, %p547_p5 }
  0x32   :  { %557 = shalt.err (!%p554_p9)
}
  0x33   :  { %56 = dma.hbm_to_vmem [thread:$0]  %s723_s5, 1024, %s51_s29, [#allocation7], %s587_s11, %s587_s11, %s588_s12  }
  0x34   :  { %580 = dma.done.wait [#allocation4], 256  }
  0x35   :  { %581 = vsyncadd [#allocation4], 4294967040 }
  0x36   :  { %582 = dma.done.wait [#allocation7], 1408  }
  0x37   :  { %583 = vsyncadd [#allocation7], 4294965888  ;;  %v593_v0 = vmov 0   ;;  %v594_v1 = vmov 0.0   ;;  %vm595_vm0 = vmmov 0   ;;  %v75_v2 = vld [vmem:[%s718_s0] sm:$0xff]  ;;  %v73_v20 = vlaneseq }
  0x38   :  { %480 = vset.pattern.permute.xlu0 %v593_v0  ;;  %426 = vmatprep.subr.bf16.mxu0 %v594_v1  ;;  %v481_v3 = vld [vmem:[#allocation6] sm:$0xff]   ;;  %v482_v5 = vld [vmem:[#allocation6 + $0x8] sm:$0xff]   ;;  %v89_v6 = vld [vmem:[%s720_s2] sm:$0xff]  ;;  %vm126_vm1 = vcmask 392192   ;;  %vm171_vm2 = vcmask 195584   ;;  %s596_s28 = smov [#allocation9]  }
  0x39   :  { %432 = vmatprep.mubr.msk.bf16.mxu0 %vm595_vm0, %v594_v1  ;;  %445 = vmatprep.subr.bf16.mxu1 %v594_v1  ;;  %v76_v4 = vld [vmem:[%s718_s0 + $0x8] sm:$0xff]  ;;  %v483_v7 = vld [vmem:[#allocation6 + $0x10] sm:$0xff]   ;;  %v93_v10 = vld [vmem:[#allocation3 + $0x8] sm:$0xff]  ;;  %v74_v21 = vand.u32 127, %v73_v20  ;;  %s377_s29 = sshll.u32 %s596_s28, 4  ;;  %s378_s29 = int_to_ptr.vmem [resolvable:$true] %s377_s29 }
  0x3a   :  { %461 = vmatprep.mubr.msk.bf16.mxu1 %vm595_vm0, %v594_v1  ;;  %78 = vperm.xlu0 %480, %v75_v2   ;;  %v92_v8 = vld [vmem:[#allocation3] sm:$0xff]  ;;  %v90_v9 = vld [vmem:[%s720_s2 + $0x8] sm:$0xff]  ;;  %v484_v11 = vld [vmem:[#allocation8] sm:$0xff]   ;;  %p563_p11 = scmp.lt.s32.totalorder %s378_s29, %s378_s29 }
  0x3b   :  { %427 = vmatpush3.bf16.msra.mxu0 %v481_v3  ;;  %v465_v12 = vpack.c.bf16 %v90_v9, %v89_v6  ;;  %v485_v13 = vld [vmem:[#allocation8 + $0x8] sm:$0xff]   ;;  %446 = vmatpush3.bf16.msra.mxu1 %v484_v11  ;;  %v94_v14 = vpack.c.bf16 %v93_v10, %v92_v8  ;;  %v91_v15 = vld [vmem:[%s720_s2 + $0x10] sm:$0xff]  ;;  %v487_v17 = vld [vmem:[#allocation8 + $0x18] sm:$0xff]  }
  0x3c   :  { %428 = vmatprep.subr.bf16.mxu0 %v594_v1  ;;  %447 = vmatprep.subr.bf16.mxu1 %v594_v1  ;;  %v486_v16 = vld [vmem:[#allocation8 + $0x10] sm:$0xff]   ;;  %v488_v18 = vld [vmem:[#allocation8 + $0x20] sm:$0xff]   ;;  %v489_v19 = vld [vmem:[#allocation8 + $0x28] sm:$0xff]  }
  0x3d   :  { %v490_v26 = vld [vmem:[#allocation8 + $0x30] sm:$0xff]   ;;  %v491_v27 = vld [vmem:[#allocation8 + $0x38] sm:$0xff]   ;;  %v392_v32 = vld [vmem:[%s722_s4] ss:$0 sm:$0xff]  ;;  %s558_s4 = scalar_lea.vmem %s378_s29, 256 }
  0x3e   :  { %81 = vperm.xlu0 %480, %v76_v4   ;;  %v399_v42 = vld [vmem:[%s724_s6] ss:$0 sm:$0xff]  ;;  %p559_p10 = scmp.ne.s32.totalorder %s378_s29, %s558_s4  ;;  %p564_p12 = scmp.lt.s32.totalorder %s558_s4, %s558_s4 }
  0x3f   :  { %429 = vmatpush3.bf16.msra.mxu0 %v482_v5  ;;  %448 = vmatpush3.bf16.msra.mxu1 %v485_v13 }
  0x40   :  { %430 = vmatprep.subr.bf16.mxu0 %v594_v1  ;;  %449 = vmatprep.subr.bf16.mxu1 %v594_v1  ;;  %p565_p13 = por %p564_p12, %p563_p11 }
  0x42   :  { %p566_p0 = pnand %p565_p13, %p559_p10 }
  0x43   :  { %431 = vmatpush3.bf16.msra.mxu0 %v483_v7  ;;  %450 = vmatpush3.bf16.msra.mxu1 %v486_v16 }
  0x44   :  { %466 = vmatprep.subr.bf16.mxu0 %v465_v12  ;;  %451 = vmatprep.subr.bf16.mxu1 %v594_v1 }
  0x46   :  { %433 = vmatmul.mubr.msk.bf16.vlgmr.msra.gmra.mrb[0].mxu0 %vm126_vm1, %v94_v14 }
  0x47   :  { %468 = vmatpush3.bf16.msra.mxu0 %v465_v12  ;;  %452 = vmatpush3.bf16.msra.mxu1 %v487_v17 }
  0x48   :  { %440 = vmatprep.subr.mxu0 %v91_v15  ;;  %453 = vmatprep.subr.bf16.mxu1 %v594_v1 }
  0x4b   :  { %441 = vmatpush3.msra.mxu0 %v91_v15  ;;  %454 = vmatpush3.bf16.msra.mxu1 %v488_v18 }
  0x4c   :  { %455 = vmatprep.subr.bf16.mxu1 %v594_v1 }
  0x4f   :  { %456 = vmatpush3.bf16.msra.mxu1 %v489_v19 }
  0x50   :  { %457 = vmatprep.subr.bf16.mxu1 %v594_v1 }
  0x53   :  { %458 = vmatpush3.bf16.msra.mxu1 %v490_v26 }
  0x54   :  { %459 = vmatprep.subr.bf16.mxu1 %v594_v1 }
  0x57   :  { %460 = vmatpush3.bf16.msra.mxu1 %v491_v27 }
  0xb9   :  { %v79_v22 = vpop.permute.xlu0 %78 }
  0xba   :  { %vm83_vm3 = vcmp.eq.s32.totalorder %v74_v21, %v79_v22 }
  0xbb   :  { %v390_v23 = vsel %vm83_vm3, 1.0, %v594_v1 }
  0xbc   :  { %442 = vmatprep.mubr.msk.f32.mxu0 %vm171_vm2, %v390_v23 }
  0xbd   :  { %v82_v24 = vpop.permute.xlu0 %81 }
  0xbe   :  { %vm84_vm4 = vcmp.eq.s32.totalorder %v74_v21, %v82_v24 }
  0xbf   :  { %v391_v25 = vsel %vm84_vm4, 1.0, %v594_v1 }
  0xc0   :  { %443 = vmatmul.mubr.msk.f32.vlgmr.msra.gmra.mrb[4].mxu0 %vm171_vm2, %v391_v25 }
 0x119   :  { %v164_v28 = vpop.f32.mrb[0].mxu0 }
 0x11a   :  { %v434_v29 = vpop.f32.mrb[1].mxu0  ;;  %v165_v34 = vadd.f32 %v392_v32, %v164_v28 }
 0x11b   :  { %v167_v30 = vpop.f32.mrb[2].mxu0 }
 0x11c   :  { %v435_v31 = vpop.f32.mrb[3].mxu0  ;;  %v168_v33 = vadd.f32 %v392_v32, %v167_v30 }
 0x193   :  { %v444_v35 = vpop.f32.mrb[4].mxu0 }
 0x194   :  { %v250_v36 = vadd.f32 %v444_v35, %v168_v33  ;;  %v244_v37 = vpop.f32.mrb[5].mxu0 }
 0x195   :  { %v245_v38 = vadd.f32 %v244_v37, %v165_v34 }
 0x196   :  { %v254_v39 = vmax.f32 %v250_v36, 0.0 }
 0x197   :  { %v253_v40 = vmax.f32 %v245_v38, 0.0 }
 0x199   :  { %v255_v41 = vpack.c.bf16 %v254_v39, %v253_v40 }
 0x19b   :  { %462 = vmatmul.mubr.bf16.vlgmr.msra.gmra.mrb[0].mxu1 %v255_v41 }
 0x26e   :  { %v363_v43 = vpop.f32.mrb[0].mxu1 }
 0x26f   :  { %v364_v44 = vadd.f32 %v399_v42, %v363_v43  ;;  %v463_v45 = vpop.f32.mrb[1].mxu1 }
 0x270   :  { %v366_v46 = vpop.f32.mrb[2].mxu1 }
 0x271   :  { %370 = vst [vmem:[#allocation9] sm:$0xff] %v364_v44  ;;  %v367_v47 = vadd.f32 %v399_v42, %v366_v46  ;;  %v464_v48 = vpop.f32.mrb[3].mxu1 }
 0x273   :  { %371 = vst [vmem:[#allocation9 + $0x8] sm:$0xff] %v367_v47 }
 0x274   :  { %569 = shalt.err (!%p566_p0)
}
 0x275   :  { %s570_s8 = scalar_lea.hbm %s725_s7, 256 }
 0x276   :  { %p571_p1 = scmp.ne.s32.totalorder %s725_s7, %s570_s8  ;;  %p574_p2 = scmp.lt.u32.totalorder %s570_s8, %s725_s7 }
 0x278   :  { %p576_p3 = pnand %p574_p2, %p571_p1 }
 0x27a   :  { %579 = shalt.err (!%p576_p3)
}
 0x27b   :  { %383 = dma.vmem_to_hbm [thread:$0]  %s378_s29, 256, %s725_s7, [#allocation5], %s590_s3, %s590_s3, %s591_s25  }
 0x27c   :  { %584 = dma.done.wait [#allocation5], 256  }
 0x27d   :  { %585 = vsyncadd [#allocation5], 4294967040 }
 0x27e   :  { %387 = vsyncpa [#allocation4], 1 }
 0x27f   :  { %388 = vsyncpa [#allocation7], 1 }
 0x280   :  { %389 = vsyncpa [#allocation5], 1 }

</bundles_post_ra>
